<compile_context>
chip_gen: v5e
topology: v5e:2x2
jax: 0.10.0
libtpu: 0.0.40
codegen_flags: <defaults>
</compile_context>

<pallas_src>
import functools

import jax
import jax.numpy as jnp
from jax.experimental import pallas as pl
from jax.experimental.pallas import tpu as pltpu

LANE = 128       # TPU lane width: hidden/output dims are padded to this offline.
TM_MAX = 512     # batch-row tile; 4 MiB double-buffered f32 x tile, fine on v5e/v6e/v7x.


def _round_up(n, m):
    return ((n + m - 1) // m) * m


def fcnet_kernel(x_ref, w1t_ref, slab_ref, o_ref, *, hp, op):
    """Fused forward for one (TM, input_size) row tile.

    slab layout (bf16, lane-dense, all offsets 8-row aligned):
      rows [0, hp)        : w3^T  (padded to hp x hp)
      rows [hp, 2*hp)     : w2^T  (padded to hp x op)
      row  2*hp           : b1    (padded to hp lanes)
      row  2*hp + 8       : b3
      row  2*hp + 16      : b2    (padded to op lanes)
    Padding entries are zero, so the padded math is exact.
    """
    x = x_ref[...].astype(jnp.bfloat16)                      # MXU feed dtype

    # Static slices of a VMEM ref: zero-cost views.
    w3t = slab_ref[0:hp, 0:hp]
    w2t = slab_ref[hp:2 * hp, 0:op]
    b1 = slab_ref[2 * hp + 0:2 * hp + 1, 0:hp].astype(jnp.float32)
    b3 = slab_ref[2 * hp + 8:2 * hp + 9, 0:hp].astype(jnp.float32)
    b2 = slab_ref[2 * hp + 16:2 * hp + 17, 0:op].astype(jnp.float32)

    # fc1 + ReLU   (w1 pre-transposed offline -> canonical (M,K)x(K,N))
    h = jnp.dot(x, w1t_ref[...], preferred_element_type=jnp.float32) + b1
    h = jnp.maximum(h, 0.0)

    # fc3 + ReLU, applied twice (exactly as the PyTorch forward; fc4 unused there)
    h = jnp.dot(h.astype(jnp.bfloat16), w3t, preferred_element_type=jnp.float32) + b3
    h = jnp.maximum(h, 0.0)
    h = jnp.dot(h.astype(jnp.bfloat16), w3t, preferred_element_type=jnp.float32) + b3
    h = jnp.maximum(h, 0.0)

    # fc2 (no activation).  Columns >= output_size are exactly zero by construction.
    out = jnp.dot(h.astype(jnp.bfloat16), w2t, preferred_element_type=jnp.float32) + b2
    o_ref[...] = out.astype(o_ref.dtype)


def prepare_params(params, input_size, hidden_size, output_size):
    """One-time (out-of-hot-path) conversion to kernel-ready layout/dtypes."""
    hp = _round_up(hidden_size, LANE)
    op = _round_up(output_size, LANE)
    cols = max(hp, op)

    # w1^T, lane-dense (input_size, hp), bf16.
    w1t = jnp.zeros((input_size, hp), jnp.bfloat16)
    w1t = w1t.at[:, :hidden_size].set(params["w1"].T.astype(jnp.bfloat16))

    # Single slab for all small params (w3^T, w2^T, b1, b3, b2).
    slab_rows = 2 * hp + 24
    slab = jnp.zeros((slab_rows, cols), jnp.bfloat16)
    slab = slab.at[:hidden_size, :hidden_size].set(params["w3"].T.astype(jnp.bfloat16))
    slab = slab.at[hp:hp + hidden_size, :output_size].set(params["w2"].T.astype(jnp.bfloat16))
    slab = slab.at[2 * hp + 0, :hidden_size].set(params["b1"].astype(jnp.bfloat16))
    slab = slab.at[2 * hp + 8, :hidden_size].set(params["b3"].astype(jnp.bfloat16))
    slab = slab.at[2 * hp + 16, :output_size].set(params["b2"].astype(jnp.bfloat16))

    return dict(w1t=w1t, slab=slab, input=input_size, hidden=hidden_size,
                output=output_size, hp=hp, op=op)


def fcnet_forward(x_nchw, kparams, tm=TM_MAX):
    """x_nchw: (B, C, H, W) float32.  kparams: output of prepare_params()."""
    B = x_nchw.shape[0]
    input_size = kparams["input"]
    hp, op = kparams["hp"], kparams["op"]

    x = x_nchw.reshape(B, -1)          # same semantics as torch x.view(x.size(0), -1)
    assert x.shape[1] == input_size

    # Row tile: big for real batches, shrinks (but stays 8-aligned) for tiny ones.
    tm_eff = min(tm, _round_up(B, 8))
    b_pad = _round_up(B, tm_eff)
    if b_pad != B:
        x = jnp.pad(x, ((0, b_pad - B), (0, 0)))

    grid = (b_pad // tm_eff,)
    slab_shape = kparams["slab"].shape

    out = pl.pallas_call(
        functools.partial(fcnet_kernel, hp=hp, op=op),
        out_shape=jax.ShapeDtypeStruct((b_pad, op), jnp.float32),
        grid_spec=pltpu.PrefetchScalarGridSpec(
            num_scalar_prefetch=0,
            grid=grid,
            in_specs=[
                pl.BlockSpec((tm_eff, input_size), lambda i: (i, 0)),   # x: tiled rows
                pl.BlockSpec((input_size, hp), lambda i: (0, 0)),       # w1^T: resident
                pl.BlockSpec(slab_shape, lambda i: (0, 0)),             # slab: resident
            ],
            out_specs=pl.BlockSpec((tm_eff, op), lambda i: (i, 0)),
        ),
        compiler_params=pltpu.CompilerParams(
            dimension_semantics=("parallel",),      # megacore sharding on v7x
        ),
    )(x, kparams["w1t"], kparams["slab"])

    return out[:B, :kparams["output"]]


def init_params(key, input_size, hidden_size, output_size):
    """Deterministic init mimicking nn.Linear (uniform(-1/sqrt(fan_in), 1/sqrt(fan_in)))."""
    def linear(k, fan_in, fan_out):
        kw, kb = jax.random.split(k)
        bound = 1.0 / jnp.sqrt(fan_in)
        w = jax.random.uniform(kw, (fan_out, fan_in), jnp.float32, -bound, bound)
        b = jax.random.uniform(kb, (fan_out,), jnp.float32, -bound, bound)
        return w, b

    k1, k3, k4, k2 = jax.random.split(key, 4)
    w1, b1 = linear(k1, input_size, hidden_size)
    w3, b3 = linear(k3, hidden_size, hidden_size)
    w4, b4 = linear(k4, hidden_size, hidden_size)  # defined but unused in forward
    w2, b2 = linear(k2, hidden_size, output_size)
    return dict(w1=w1, b1=b1, w3=w3, b3=b3, w4=w4, b4=b4, w2=w2, b2=b2)


if __name__ == "__main__":
    key = jax.random.PRNGKey(0)
    kx, kp = jax.random.split(key)

    # Small shapes consistent with the module: x is (B, C, H, W), flattened to input_size.
    B, C, H, W = 2, 4, 16, 16
    input_size = C * H * W          # 1024
    hidden_size = 32
    output_size = 16

    x = jax.random.normal(kx, (B, C, H, W), jnp.float32)
    params = init_params(kp, input_size, hidden_size, output_size)

    # Layout/dtype prep happens ONCE here, outside the hot path.
    kparams = prepare_params(params, input_size, hidden_size, output_size)

    out = fcnet_forward(x, kparams)
    out = jax.block_until_ready(out)

    # Reference in plain JAX using the same bf16-quantized weights/biases.
    def q(a):
        return a.astype(jnp.bfloat16).astype(jnp.float32)

    xf = x.reshape(B, -1)
    h = jnp.maximum(xf @ q(params["w1"]).T + q(params["b1"]), 0.0)
    h = jnp.maximum(h @ q(params["w3"]).T + q(params["b3"]), 0.0)
    h = jnp.maximum(h @ q(params["w3"]).T + q(params["b3"]), 0.0)
    ref = h @ q(params["w2"]).T + q(params["b2"])

    assert out.shape == (B, output_size)
    # bf16 activations in-kernel vs f32 activations in the reference -> loosened tolerance.
    assert jnp.allclose(out, ref, atol=2e-2, rtol=2e-2)

    print("KERNEL_OK")
</pallas_src>

<mosaic_0001>
module attributes {stable_mosaic.version = 11 : i64} {
  func.func @fcnet_kernel(%arg0: i32, %arg1: memref<8x1024xf32, #tpu.memory_space<vmem>>, %arg2: memref<1024x128xbf16, #tpu.memory_space<vmem>>, %arg3: memref<280x128xbf16, #tpu.memory_space<vmem>>, %arg4: memref<8x128xf32, #tpu.memory_space<vmem>>) attributes {dimension_semantics = [#tpu.dimension_semantics<parallel>], iteration_bounds = array<i64: 1>, scalar_prefetch = 0 : i64, scratch_operands = 0 : i64, tpu.core_type = #tpu.core_type<tc>, window_params = [{transform_indices = @transform_0, window_bounds = array<i64: 8, 1024>}, {pipeline_mode = #tpu.pipeline_mode<synchronous>, transform_indices = @transform_1, window_bounds = array<i64: 1024, 128>}, {pipeline_mode = #tpu.pipeline_mode<synchronous>, transform_indices = @transform_2, window_bounds = array<i64: 280, 128>}, {transform_indices = @transform_3, window_bounds = array<i64: 8, 128>}]} {
    %c0 = arith.constant 0 : index
    %c0_0 = arith.constant 0 : index
    %0 = vector.load %arg1[%c0, %c0_0] : memref<8x1024xf32, #tpu.memory_space<vmem>>, vector<8x1024xf32>
    %1 = arith.truncf %0 : vector<8x1024xf32> to vector<8x1024xbf16>
    %c0_1 = arith.constant 0 : index
    %c0_2 = arith.constant 0 : index
    %2 = vector.load %arg3[%c0_1, %c0_2] : memref<280x128xbf16, #tpu.memory_space<vmem>>, vector<128x128xbf16>
    %c128 = arith.constant 128 : index
    %c0_3 = arith.constant 0 : index
    %3 = vector.load %arg3[%c128, %c0_3] : memref<280x128xbf16, #tpu.memory_space<vmem>>, vector<128x128xbf16>
    %c256 = arith.constant 256 : index
    %c0_4 = arith.constant 0 : index
    %4 = vector.load %arg3[%c256, %c0_4] : memref<280x128xbf16, #tpu.memory_space<vmem>>, vector<1x128xbf16>
    %5 = arith.extf %4 : vector<1x128xbf16> to vector<1x128xf32>
    %c264 = arith.constant 264 : index
    %c0_5 = arith.constant 0 : index
    %6 = vector.load %arg3[%c264, %c0_5] : memref<280x128xbf16, #tpu.memory_space<vmem>>, vector<1x128xbf16>
    %7 = arith.extf %6 : vector<1x128xbf16> to vector<1x128xf32>
    %c272 = arith.constant 272 : index
    %c0_6 = arith.constant 0 : index
    %8 = vector.load %arg3[%c272, %c0_6] : memref<280x128xbf16, #tpu.memory_space<vmem>>, vector<1x128xbf16>
    %9 = arith.extf %8 : vector<1x128xbf16> to vector<1x128xf32>
    %c0_7 = arith.constant 0 : index
    %c0_8 = arith.constant 0 : index
    %10 = vector.load %arg2[%c0_7, %c0_8] : memref<1024x128xbf16, #tpu.memory_space<vmem>>, vector<1024x128xbf16>
    %cst = arith.constant dense<0.000000e+00> : vector<8x128xf32>
    %11 = tpu.matmul %1, %10, %cst {dimension_numbers = #tpu.dot_dimension_numbers<[1], [0], [0], [1], [0, 0, 1, 1], [], []>} : vector<8x1024xbf16>, vector<1024x128xbf16>, vector<8x128xf32> -> vector<8x128xf32>
    %12 = vector.broadcast %5 : vector<1x128xf32> to vector<8x128xf32>
    %13 = arith.addf %11, %12 : vector<8x128xf32>
    %cst_9 = arith.constant 0.000000e+00 : f32
    %14 = vector.broadcast %cst_9 : f32 to vector<8x128xf32>
    %15 = arith.maximumf %13, %14 : vector<8x128xf32>
    %16 = arith.truncf %15 : vector<8x128xf32> to vector<8x128xbf16>
    %cst_10 = arith.constant dense<0.000000e+00> : vector<8x128xf32>
    %17 = tpu.matmul %16, %2, %cst_10 {dimension_numbers = #tpu.dot_dimension_numbers<[1], [0], [0], [1], [0, 0, 1, 1], [], []>} : vector<8x128xbf16>, vector<128x128xbf16>, vector<8x128xf32> -> vector<8x128xf32>
    %18 = vector.broadcast %7 : vector<1x128xf32> to vector<8x128xf32>
    %19 = arith.addf %17, %18 : vector<8x128xf32>
    %cst_11 = arith.constant 0.000000e+00 : f32
    %20 = vector.broadcast %cst_11 : f32 to vector<8x128xf32>
    %21 = arith.maximumf %19, %20 : vector<8x128xf32>
    %22 = arith.truncf %21 : vector<8x128xf32> to vector<8x128xbf16>
    %cst_12 = arith.constant dense<0.000000e+00> : vector<8x128xf32>
    %23 = tpu.matmul %22, %2, %cst_12 {dimension_numbers = #tpu.dot_dimension_numbers<[1], [0], [0], [1], [0, 0, 1, 1], [], []>} : vector<8x128xbf16>, vector<128x128xbf16>, vector<8x128xf32> -> vector<8x128xf32>
    %24 = vector.broadcast %7 : vector<1x128xf32> to vector<8x128xf32>
    %25 = arith.addf %23, %24 : vector<8x128xf32>
    %cst_13 = arith.constant 0.000000e+00 : f32
    %26 = vector.broadcast %cst_13 : f32 to vector<8x128xf32>
    %27 = arith.maximumf %25, %26 : vector<8x128xf32>
    %28 = arith.truncf %27 : vector<8x128xf32> to vector<8x128xbf16>
    %cst_14 = arith.constant dense<0.000000e+00> : vector<8x128xf32>
    %29 = tpu.matmul %28, %3, %cst_14 {dimension_numbers = #tpu.dot_dimension_numbers<[1], [0], [0], [1], [0, 0, 1, 1], [], []>} : vector<8x128xbf16>, vector<128x128xbf16>, vector<8x128xf32> -> vector<8x128xf32>
    %30 = vector.broadcast %9 : vector<1x128xf32> to vector<8x128xf32>
    %31 = arith.addf %29, %30 : vector<8x128xf32>
    %c0_15 = arith.constant 0 : index
    %c0_16 = arith.constant 0 : index
    %32 = vector.load %arg4[%c0_15, %c0_16] : memref<8x128xf32, #tpu.memory_space<vmem>>, vector<8x128xf32>
    tpu.vector_store %arg4[%c0_15, %c0_16], %31 {strides = array<i32>} : memref<8x128xf32, #tpu.memory_space<vmem>>, vector<8x128xf32>,
    return
  }
  func.func @transform_0(%arg0: i32) -> (i32, i32) {
    %c0_i32 = arith.constant 0 : i32
    %c0_i32_0 = arith.constant 0 : i32
    return %arg0, %c0_i32 : i32, i32
  }
  func.func @transform_1(%arg0: i32) -> (i32, i32) {
    %c0_i32 = arith.constant 0 : i32
    %c0_i32_0 = arith.constant 0 : i32
    %c0_i32_1 = arith.constant 0 : i32
    return %c0_i32, %c0_i32_0 : i32, i32
  }
  func.func @transform_2(%arg0: i32) -> (i32, i32) {
    %c0_i32 = arith.constant 0 : i32
    %c0_i32_0 = arith.constant 0 : i32
    %c0_i32_1 = arith.constant 0 : i32
    return %c0_i32, %c0_i32_0 : i32, i32
  }
  func.func @transform_3(%arg0: i32) -> (i32, i32) {
    %c0_i32 = arith.constant 0 : i32
    %c0_i32_0 = arith.constant 0 : i32
    return %arg0, %c0_i32 : i32, i32
  }
}

</mosaic_0001>

<bundles_post_ra>
// kernel: tpu_custom_call.1
= control target key start
LH: loop header
LB: loop body
LE: loop exit
PB: predicated region body
PF: predicated region fallthrough
CT: control target
= control target key end

     0   :  { %8 = vsyncpa [#allocation3], 0  ;;  %s1439_s0 = inlined_call_operand.hbm [shape: f32[8,1024], index: 0, kind: input, shape index: {}]   ;;  %s1440_s1 = inlined_call_operand.hbm [shape: bf16[1024,128], index: 1, kind: input, shape index: {}]   ;;  %s1441_s2 = inlined_call_operand.hbm [shape: bf16[280,128], index: 2, kind: input, shape index: {}]   ;;  %s1442_s3 = inlined_call_operand.hbm [shape: f32[8,128], index: 3, kind: output, shape index: {}]  }
   0x1   :  { %9 = vsyncpa [#allocation6], 0  ;;  %s26_s14 = sshll.u32 %s1440_s1, 4  ;;  %s27_s14 = int_to_ptr.hbm [resolvable:$true] %s26_s14 }
   0x2   :  { %10 = vsyncpa [#allocation4], 0  ;;  %s1401_s15 = smov [#allocation5]   ;;  %s16_s19 = sshll.u32 %s1439_s0, 4  ;;  %s17_s19 = int_to_ptr.hbm [resolvable:$true] %s16_s19 }
   0x3   :  { %s28_s16 = sshll.u32 %s1401_s15, 4  ;;  %s1402_s20 = smov 64   ;;  %s29_s16 = int_to_ptr.vmem [resolvable:$true] %s28_s16 }
   0x4   :  { %s1403_s21 = smov 4   ;;  %s1404_s22 = smov [#allocation2]  }
   0x5   :  { %34 = dma.hbm_to_vmem [thread:$0]  %s27_s14, 8192, %s29_s16, [#allocation6], %s1402_s20, %s1402_s20, %s1403_s21  }
   0x6   :  { %s18_s23 = sshll.u32 %s1404_s22, 4  ;;  %s39_s26 = sshll.u32 %s1441_s2, 4  ;;  %s19_s23 = int_to_ptr.vmem [resolvable:$true] %s18_s23  ;;  %s40_s26 = int_to_ptr.hbm [resolvable:$true] %s39_s26 }
   0x7   :  { %21 = dma.hbm_to_vmem [thread:$0]  %s17_s19, 1024, %s19_s23, [#allocation3]  }
   0x8   :  { %s1405_s1 = smov [#allocation7]  }
   0x9   :  { %s41_s27 = sshll.u32 %s1405_s1, 4  ;;  %s42_s27 = int_to_ptr.vmem [resolvable:$true] %s41_s27 }
   0xa   :  { %47 = dma.hbm_to_vmem [thread:$0]  %s40_s26, 2240, %s42_s27, [#allocation6], %s1402_s20, %s1402_s20, %s1403_s21  }
   0xb   :  { %1395 = dma.done.wait [#allocation3], 1024  }
   0xc   :  { %1396 = vsyncadd [#allocation3], 4294966272 }
   0xd   :  { %1397 = dma.done.wait [#allocation6], 10432  }
   0xe   :  { %1398 = vsyncadd [#allocation6], 4294956864  ;;  %v1236_v0 = vld [vmem:[#allocation5 + $0x38] sm:$0xff]  ;;  %v1235_v4 = vld [vmem:[#allocation5 + $0x30] sm:$0xff]  ;;  %s1406_s0 = smov [#allocation8]   ;;  %s882_s30 = sshll.u32 %s1442_s3, 4  ;;  %s883_s30 = int_to_ptr.hbm [resolvable:$true] %s882_s30 }
   0xf   :  { %v1244_v1 = vld [vmem:[#allocation5 + $0x78] sm:$0xff]  ;;  %627 = vmatpush.bf16.msra.mxu0 %v1236_v0  ;;  %v1243_v5 = vld [vmem:[#allocation5 + $0x70] sm:$0xff]  ;;  %v1234_v8 = vld [vmem:[#allocation5 + $0x28] sm:$0xff]  ;;  %s880_s2 = sshll.u32 %s1406_s0, 4  ;;  %s881_s2 = int_to_ptr.vmem [resolvable:$true] %s880_s2 }
  0x10   :  { %v1252_v2 = vld [vmem:[#allocation5 + $0xb8] sm:$0xff]  ;;  %640 = vmatpush.bf16.msra.mxu1 %v1244_v1  ;;  %v1251_v6 = vld [vmem:[#allocation5 + $0xb0] sm:$0xff]  ;;  %v1242_v9 = vld [vmem:[#allocation5 + $0x68] sm:$0xff] }
  0x11   :  { %v1260_v3 = vld [vmem:[#allocation5 + $0xf8] sm:$0xff]  ;;  %653 = vmatpush.bf16.msra.mxu2 %v1252_v2  ;;  %v1259_v7 = vld [vmem:[#allocation5 + $0xf0] sm:$0xff]  ;;  %v1250_v10 = vld [vmem:[#allocation5 + $0xa8] sm:$0xff] }
  0x12   :  { %666 = vmatpush.bf16.msra.mxu3 %v1260_v3  ;;  %v1258_v11 = vld [vmem:[#allocation5 + $0xe8] sm:$0xff]  ;;  %v1233_v12 = vld [vmem:[#allocation5 + $0x20] sm:$0xff]  ;;  %v1232_v16 = vld [vmem:[#allocation5 + $0x18] sm:$0xff] }
  0x13   :  { %628 = vmatpush.bf16.msra.mxu0 %v1235_v4  ;;  %v1241_v13 = vld [vmem:[#allocation5 + $0x60] sm:$0xff]  ;;  %v1240_v17 = vld [vmem:[#allocation5 + $0x58] sm:$0xff]  ;;  %v1231_v20 = vld [vmem:[#allocation5 + $0x10] sm:$0xff] }
  0x14   :  { %641 = vmatpush.bf16.msra.mxu1 %v1243_v5  ;;  %v1249_v14 = vld [vmem:[#allocation5 + $0xa0] sm:$0xff]  ;;  %v1248_v18 = vld [vmem:[#allocation5 + $0x98] sm:$0xff]  ;;  %v1239_v21 = vld [vmem:[#allocation5 + $0x50] sm:$0xff] }
  0x15   :  { %654 = vmatpush.bf16.msra.mxu2 %v1251_v6  ;;  %v1257_v15 = vld [vmem:[#allocation5 + $0xe0] sm:$0xff]  ;;  %v1256_v19 = vld [vmem:[#allocation5 + $0xd8] sm:$0xff]  ;;  %v1247_v22 = vld [vmem:[#allocation5 + $0x90] sm:$0xff] }
  0x16   :  { %667 = vmatpush.bf16.msra.mxu3 %v1259_v7  ;;  %v1255_v23 = vld [vmem:[#allocation5 + $0xd0] sm:$0xff]  ;;  %v1230_v24 = vld [vmem:[#allocation5 + $0x8] sm:$0xff]  ;;  %v1229_v28 = vld [vmem:[#allocation5] sm:$0xff] }
  0x17   :  { %629 = vmatpush.bf16.msra.mxu0 %v1234_v8  ;;  %v1238_v25 = vld [vmem:[#allocation5 + $0x48] sm:$0xff]  ;;  %v1237_v29 = vld [vmem:[#allocation5 + $0x40] sm:$0xff]  ;;  %v1268_v32 = vld [vmem:[#allocation5 + $0x138] sm:$0xff] }
  0x18   :  { %642 = vmatpush.bf16.msra.mxu1 %v1242_v9  ;;  %v1246_v26 = vld [vmem:[#allocation5 + $0x88] sm:$0xff]  ;;  %v1245_v30 = vld [vmem:[#allocation5 + $0x80] sm:$0xff]  ;;  %v62_v33 = vld [vmem:[#allocation2 + $0x10] sm:$0xff] }
  0x19   :  { %655 = vmatpush.bf16.msra.mxu2 %v1250_v10  ;;  %v1254_v27 = vld [vmem:[#allocation5 + $0xc8] sm:$0xff]  ;;  %v1253_v31 = vld [vmem:[#allocation5 + $0xc0] sm:$0xff]  ;;  %v1276_v35 = vld [vmem:[#allocation5 + $0x178] sm:$0xff]  ;;  %v70_v40 = vpack.c.bf16 %v62_v33, %v62_v33 }
  0x1a   :  { %668 = vmatpush.bf16.msra.mxu3 %v1258_v11  ;;  %v60_v34 = vld [vmem:[#allocation2] sm:$0xff]  ;;  %v63_v36 = vld [vmem:[#allocation2 + $0x18] sm:$0xff]  ;;  %v61_v37 = vld [vmem:[#allocation2 + $0x8] sm:$0xff] }
  0x1b   :  { %630 = vmatpush.bf16.msra.mxu0 %v1233_v12  ;;  %v1284_v38 = vld [vmem:[#allocation5 + $0x1b8] sm:$0xff]  ;;  %v68_v41 = vpack.c.bf16 %v60_v34, %v60_v34  ;;  %v71_v42 = vpack.c.bf16 %v63_v36, %v63_v36  ;;  %v69_v43 = vpack.c.bf16 %v61_v37, %v61_v37  ;;  %v1267_v44 = vld [vmem:[#allocation5 + $0x130] sm:$0xff]  ;;  %v1266_v48 = vld [vmem:[#allocation5 + $0x128] sm:$0xff] }
  0x1c   :  { %643 = vmatpush.bf16.msra.mxu1 %v1241_v13  ;;  %v1292_v39 = vld [vmem:[#allocation5 + $0x1f8] sm:$0xff]  ;;  %v1275_v45 = vld [vmem:[#allocation5 + $0x170] sm:$0xff]  ;;  %v1274_v49 = vld [vmem:[#allocation5 + $0x168] sm:$0xff] }
  0x1d   :  { %656 = vmatpush.bf16.msra.mxu2 %v1249_v14  ;;  %v1283_v46 = vld [vmem:[#allocation5 + $0x1b0] sm:$0xff]  ;;  %v1282_v50 = vld [vmem:[#allocation5 + $0x1a8] sm:$0xff]  ;;  %v1265_v52 = vld [vmem:[#allocation5 + $0x120] sm:$0xff] }
  0x1e   :  { %669 = vmatpush.bf16.msra.mxu3 %v1257_v15  ;;  %v1291_v47 = vld [vmem:[#allocation5 + $0x1f0] sm:$0xff]  ;;  %v1290_v51 = vld [vmem:[#allocation5 + $0x1e8] sm:$0xff]  ;;  %v1273_v53 = vld [vmem:[#allocation5 + $0x160] sm:$0xff] }
  0x1f   :  { %631 = vmatpush.bf16.msra.mxu0 %v1232_v16  ;;  %v1281_v54 = vld [vmem:[#allocation5 + $0x1a0] sm:$0xff]  ;;  %v1264_v56 = vld [vmem:[#allocation5 + $0x118] sm:$0xff]  ;;  %v1263_v60 = vld [vmem:[#allocation5 + $0x110] sm:$0xff] }
  0x20   :  { %644 = vmatpush.bf16.msra.mxu1 %v1240_v17  ;;  %v1289_v55 = vld [vmem:[#allocation5 + $0x1e0] sm:$0xff]  ;;  %v1272_v57 = vld [vmem:[#allocation5 + $0x158] sm:$0xff]  ;;  %v1271_v61 = vld [vmem:[#allocation5 + $0x150] sm:$0xff] }
  0x21   :  { %657 = vmatpush.bf16.msra.mxu2 %v1248_v18  ;;  %v1280_v58 = vld [vmem:[#allocation5 + $0x198] sm:$0xff]  ;;  %v1279_v62 = vld [vmem:[#allocation5 + $0x190] sm:$0xff]  ;;  %v1262_v0 = vld [vmem:[#allocation5 + $0x108] sm:$0xff] }
  0x22   :  { %670 = vmatpush.bf16.msra.mxu3 %v1256_v19  ;;  %v1288_v59 = vld [vmem:[#allocation5 + $0x1d8] sm:$0xff]  ;;  %v1287_v63 = vld [vmem:[#allocation5 + $0x1d0] sm:$0xff]  ;;  %v1270_v1 = vld [vmem:[#allocation5 + $0x148] sm:$0xff] }
  0x23   :  { %632 = vmatpush.bf16.msra.mxu0 %v1231_v20  ;;  %v1278_v2 = vld [vmem:[#allocation5 + $0x188] sm:$0xff]  ;;  %v1261_v4 = vld [vmem:[#allocation5 + $0x100] sm:$0xff]  ;;  %v66_v10 = vld [vmem:[#allocation2 + $0x30] sm:$0xff] }
  0x24   :  { %645 = vmatpush.bf16.msra.mxu1 %v1239_v21  ;;  %v1286_v3 = vld [vmem:[#allocation5 + $0x1c8] sm:$0xff]  ;;  %v1269_v5 = vld [vmem:[#allocation5 + $0x140] sm:$0xff]  ;;  %v67_v11 = vld [vmem:[#allocation2 + $0x38] sm:$0xff]  ;;  %v74_v14 = vpack.c.bf16 %v66_v10, %v66_v10 }
  0x25   :  { %658 = vmatpush.bf16.msra.mxu2 %v1247_v22  ;;  %v1277_v6 = vld [vmem:[#allocation5 + $0x180] sm:$0xff]  ;;  %v65_v8 = vld [vmem:[#allocation2 + $0x28] sm:$0xff]  ;;  %v75_v15 = vpack.c.bf16 %v67_v11, %v67_v11  ;;  %v1220_v16 = vld [vmem:[#allocation7 + $0x38] sm:$0xff] }
  0x26   :  { %671 = vmatpush.bf16.msra.mxu3 %v1255_v23  ;;  %v64_v7 = vld [vmem:[#allocation2 + $0x20] sm:$0xff]  ;;  %v73_v13 = vpack.c.bf16 %v65_v8, %v65_v8  ;;  %v1219_v17 = vld [vmem:[#allocation7 + $0x30] sm:$0xff]  ;;  %v1218_v18 = vld [vmem:[#allocation7 + $0x28] sm:$0xff] }
  0x27   :  { %633 = vmatpush.bf16.msra.mxu0 %v1230_v24  ;;  %v1285_v9 = vld [vmem:[#allocation5 + $0x1c0] sm:$0xff]  ;;  %v72_v12 = vpack.c.bf16 %v64_v7, %v64_v7  ;;  %v1216_v20 = vld [vmem:[#allocation7 + $0x18] sm:$0xff]  ;;  %v1215_v22 = vld [vmem:[#allocation7 + $0x10] sm:$0xff] }
  0x28   :  { %646 = vmatpush.bf16.msra.mxu1 %v1238_v25  ;;  %v1217_v19 = vld [vmem:[#allocation7 + $0x20] sm:$0xff]  ;;  %v1214_v24 = vld [vmem:[#allocation7 + $0x8] sm:$0xff] }
  0x29   :  { %659 = vmatpush.bf16.msra.mxu2 %v1246_v26  ;;  %v108_v25 = vld [vmem:[#allocation7 + $0x80] sm:$0x1]  ;;  %v112_v10 = vld [vmem:[#allocation7 + $0x88] sm:$0x1] }
  0x2a   :  { %672 = vmatpush.bf16.msra.mxu3 %v1254_v27  ;;  %v113_v11 = vunpack.c.l.bf16 %v112_v10 }
  0x2b   :  { %634 = vmatpush.bf16.msra.mxu0 %v1229_v28 }
  0x2c   :  { %647 = vmatpush.bf16.msra.mxu1 %v1237_v29  ;;  %v1213_v29 = vld [vmem:[#allocation7] sm:$0xff] }
  0x2d   :  { %660 = vmatpush.bf16.msra.mxu2 %v1245_v30  ;;  %v109_v30 = vunpack.c.l.bf16 %v108_v25 }
  0x2e   :  { %673 = vmatpush.bf16.msra.mxu3 %v1253_v31  ;;  %635 = vmatmul.bf16.vlgmr.msra.gmra.mxu0 %v68_v41 }
  0x2f   :  { %679 = vmatpush.bf16.msrb.mxu0 %v1268_v32  ;;  %648 = vmatmul.bf16.vlgmr.msra.gmra.mxu1 %v69_v43  ;;  %v242_v32 = vperm.slane %v109_v30, 0 }
  0x30   :  { %692 = vmatpush.bf16.msrb.mxu1 %v1276_v35  ;;  %661 = vmatmul.bf16.vlgmr.msra.gmra.mxu2 %v70_v40 }
  0x31   :  { %705 = vmatpush.bf16.msrb.mxu2 %v1284_v38  ;;  %674 = vmatmul.bf16.vlgmr.msra.gmra.mxu3 %v71_v42 }
  0x32   :  { %718 = vmatpush.bf16.msrb.mxu3 %v1292_v39 }
  0x33   :  { %680 = vmatpush.bf16.msrb.mxu0 %v1267_v44 }
  0x34   :  { %693 = vmatpush.bf16.msrb.mxu1 %v1275_v45 }
  0x35   :  { %706 = vmatpush.bf16.msrb.mxu2 %v1283_v46 }
  0x36   :  { %719 = vmatpush.bf16.msrb.mxu3 %v1291_v47 }
  0x37   :  { %681 = vmatpush.bf16.msrb.mxu0 %v1266_v48 }
  0x38   :  { %694 = vmatpush.bf16.msrb.mxu1 %v1274_v49 }
  0x39   :  { %707 = vmatpush.bf16.msrb.mxu2 %v1282_v50 }
  0x3a   :  { %720 = vmatpush.bf16.msrb.mxu3 %v1290_v51 }
  0x3b   :  { %682 = vmatpush.bf16.msrb.mxu0 %v1265_v52 }
  0x3c   :  { %695 = vmatpush.bf16.msrb.mxu1 %v1273_v53  ;;  %v1228_v53 = vld [vmem:[#allocation7 + $0x78] sm:$0xff] }
  0x3d   :  { %708 = vmatpush.bf16.msrb.mxu2 %v1281_v54  ;;  %v1227_v54 = vld [vmem:[#allocation7 + $0x70] sm:$0xff] }
  0x3e   :  { %721 = vmatpush.bf16.msrb.mxu3 %v1289_v55  ;;  %v1226_v55 = vld [vmem:[#allocation7 + $0x68] sm:$0xff] }
  0x3f   :  { %683 = vmatpush.bf16.msrb.mxu0 %v1264_v56  ;;  %v1225_v56 = vld [vmem:[#allocation7 + $0x60] sm:$0xff] }
  0x40   :  { %696 = vmatpush.bf16.msrb.mxu1 %v1272_v57  ;;  %v110_v57 = vld [vmem:[#allocation7 + $0x84] sm:$0x1] }
  0x41   :  { %709 = vmatpush.bf16.msrb.mxu2 %v1280_v58  ;;  %v1224_v58 = vld [vmem:[#allocation7 + $0x58] sm:$0xff] }
  0x42   :  { %722 = vmatpush.bf16.msrb.mxu3 %v1288_v59  ;;  %v111_v59 = vunpack.c.l.bf16 %v110_v57 }
  0x43   :  { %684 = vmatpush.bf16.msrb.mxu0 %v1263_v60  ;;  %v1223_v60 = vld [vmem:[#allocation7 + $0x50] sm:$0xff] }
  0x44   :  { %697 = vmatpush.bf16.msrb.mxu1 %v1271_v61  ;;  %v733_v61 = vperm.slane %v111_v59, 0 }
  0x45   :  { %710 = vmatpush.bf16.msrb.mxu2 %v1279_v62 }
  0x46   :  { %723 = vmatpush.bf16.msrb.mxu3 %v1287_v63 }
  0x47   :  { %685 = vmatpush.bf16.msrb.mxu0 %v1262_v0 }
  0x48   :  { %698 = vmatpush.bf16.msrb.mxu1 %v1270_v1 }
  0x49   :  { %711 = vmatpush.bf16.msrb.mxu2 %v1278_v2 }
  0x4a   :  { %724 = vmatpush.bf16.msrb.mxu3 %v1286_v3  ;;  %v1222_v3 = vld [vmem:[#allocation7 + $0x48] sm:$0xff] }
  0x4b   :  { %686 = vmatpush.bf16.msrb.mxu0 %v1261_v4  ;;  %v1221_v4 = vld [vmem:[#allocation7 + $0x40] sm:$0xff] }
  0x4c   :  { %699 = vmatpush.bf16.msrb.mxu1 %v1269_v5 }
  0x4d   :  { %712 = vmatpush.bf16.msrb.mxu2 %v1277_v6 }
  0x4e   :  { %725 = vmatpush.bf16.msrb.mxu3 %v1285_v9  ;;  %687 = vmatmul.bf16.vlgmr.msrb.gmra.mxu0 %v72_v12  ;;  %v812_v12 = vperm.slane %v113_v11, 0 }
  0x4f   :  { %700 = vmatmul.bf16.vlgmr.msrb.gmra.mxu1 %v73_v13  ;;  %782 = vmatpush.bf16.msra.mxu0 %v1220_v16 }
  0x50   :  { %713 = vmatmul.bf16.vlgmr.msrb.gmra.mxu2 %v74_v14  ;;  %797 = vmatpush.bf16.msra.mxu1 %v1220_v16 }
  0x51   :  { %726 = vmatmul.bf16.vlgmr.msrb.gmra.mxu3 %v75_v15  ;;  %861 = vmatpush.bf16.msra.mxu2 %v1228_v53 }
  0x53   :  { %783 = vmatpush.bf16.msra.mxu0 %v1219_v17 }
  0x54   :  { %798 = vmatpush.bf16.msra.mxu1 %v1219_v17 }
  0x55   :  { %862 = vmatpush.bf16.msra.mxu2 %v1227_v54 }
  0x57   :  { %784 = vmatpush.bf16.msra.mxu0 %v1218_v18 }
  0x58   :  { %799 = vmatpush.bf16.msra.mxu1 %v1218_v18 }
  0x59   :  { %863 = vmatpush.bf16.msra.mxu2 %v1226_v55 }
  0x5b   :  { %785 = vmatpush.bf16.msra.mxu0 %v1217_v19 }
  0x5c   :  { %800 = vmatpush.bf16.msra.mxu1 %v1217_v19 }
  0x5d   :  { %864 = vmatpush.bf16.msra.mxu2 %v1225_v56 }
  0x5f   :  { %786 = vmatpush.bf16.msra.mxu0 %v1216_v20 }
  0x60   :  { %801 = vmatpush.bf16.msra.mxu1 %v1216_v20 }
  0x61   :  { %865 = vmatpush.bf16.msra.mxu2 %v1224_v58 }
  0x63   :  { %787 = vmatpush.bf16.msra.mxu0 %v1215_v22 }
  0x64   :  { %802 = vmatpush.bf16.msra.mxu1 %v1215_v22 }
  0x65   :  { %866 = vmatpush.bf16.msra.mxu2 %v1223_v60 }
  0x67   :  { %788 = vmatpush.bf16.msra.mxu0 %v1214_v24 }
  0x68   :  { %803 = vmatpush.bf16.msra.mxu1 %v1214_v24 }
  0x69   :  { %867 = vmatpush.bf16.msra.mxu2 %v1222_v3 }
  0x6b   :  { %789 = vmatpush.bf16.msra.mxu0 %v1213_v29 }
  0x6c   :  { %804 = vmatpush.bf16.msra.mxu1 %v1213_v29 }
  0x6d   :  { %868 = vmatpush.bf16.msra.mxu2 %v1221_v4 }
  0xab   :  { %v636_v21 = vpop.f32.mrf.mxu0 }
  0xac   :  { %v649_v23 = vpop.f32.mrf.mxu1  ;;  %v637_v35 = vadd.f32 %v636_v21, %v242_v32 }
  0xae   :  { %v650_v36 = vadd.f32 %v649_v23, %v637_v35 }
  0xb3   :  { %v662_v26 = vpop.f32.mrf.mxu2  ;;  %v638_v28 = vpop.f32.mrf.mxu0 }
  0xb4   :  { %v675_v27 = vpop.f32.mrf.mxu3  ;;  %v651_v31 = vpop.f32.mrf.mxu1  ;;  %v663_v37 = vadd.f32 %v662_v26, %v650_v36 }
  0xb6   :  { %v676_v38 = vadd.f32 %v675_v27, %v663_v37 }
  0xbb   :  { %v664_v33 = vpop.f32.mrf.mxu2 }
  0xbc   :  { %v677_v34 = vpop.f32.mrf.mxu3 }
  0xcb   :  { %v688_v39 = vpop.f32.mrf.mxu0 }
  0xcc   :  { %v701_v40 = vpop.f32.mrf.mxu1  ;;  %v689_v41 = vadd.f32 %v688_v39, %v676_v38 }
  0xce   :  { %v702_v42 = vadd.f32 %v701_v40, %v689_v41 }
  0xd3   :  { %v714_v43 = vpop.f32.mrf.mxu2  ;;  %v690_v46 = vpop.f32.mrf.mxu0 }
  0xd4   :  { %v727_v44 = vpop.f32.mrf.mxu3  ;;  %v715_v45 = vadd.f32 %v714_v43, %v702_v42  ;;  %v703_v47 = vpop.f32.mrf.mxu1 }
  0xd6   :  { %v728_v48 = vadd.f32 %v727_v44, %v715_v45 }
  0xd8   :  { %v731_v49 = vmax.f32 %v728_v48, 0.0 }
  0xda   :  { %v732_v50 = vpack.c.bf16 %v731_v49, %v731_v49 }
  0xdb   :  { %v716_v51 = vpop.f32.mrf.mxu2 }
  0xdc   :  { %v729_v52 = vpop.f32.mrf.mxu3  ;;  %790 = vmatmul.bf16.vlgmr.msra.gmra.mxu0 %v732_v50 }
 0x159   :  { %v791_v62 = vpop.f32.mrf.mxu0 }
 0x15a   :  { %v792_v63 = vadd.f32 %v791_v62, %v733_v61 }
 0x15c   :  { %v795_v0 = vmax.f32 %v792_v63, 0.0 }
 0x15e   :  { %v796_v1 = vpack.c.bf16 %v795_v0, %v795_v0 }
 0x160   :  { %805 = vmatmul.bf16.vlgmr.msra.gmra.mxu1 %v796_v1 }
 0x161   :  { %v793_v2 = vpop.f32.mrf.mxu0 }
 0x1dd   :  { %v806_v5 = vpop.f32.mrf.mxu1 }
 0x1de   :  { %v807_v6 = vadd.f32 %v806_v5, %v733_v61 }
 0x1e0   :  { %v810_v7 = vmax.f32 %v807_v6, 0.0 }
 0x1e2   :  { %v811_v8 = vpack.c.bf16 %v810_v7, %v810_v7 }
 0x1e4   :  { %869 = vmatmul.bf16.vlgmr.msra.gmra.mxu2 %v811_v8 }
 0x1e5   :  { %v808_v9 = vpop.f32.mrf.mxu1 }
 0x267   :  { %v870_v13 = vpop.f32.mrf.mxu2 }
 0x268   :  { %v871_v14 = vadd.f32 %v870_v13, %v812_v12 }
 0x26a   :  { %874 = vst [vmem:[#allocation8] sm:$0xff] %v871_v14 }
 0x26b   :  { %885 = dma.vmem_to_hbm [thread:$0]  %s881_s2, 128, %s883_s30, [#allocation4]  }
 0x26f   :  { %v872_v15 = vpop.f32.mrf.mxu2 }
 0x270   :  { %1399 = dma.done.wait [#allocation4], 128  }
 0x271   :  { %1400 = vsyncadd [#allocation4], 4294967168 }
 0x272   :  { %890 = vsyncpa [#allocation3], 1 }
 0x273   :  { %891 = vsyncpa [#allocation6], 1 }
 0x274   :  { %892 = vsyncpa [#allocation4], 1 }

</bundles_post_ra>
